<compile_context>
chip_gen: v7x
topology: tpu7x:2x2x1
jax: 0.10.0
libtpu: 0.0.40
codegen_flags: <defaults>
</compile_context>

<pallas_src>
import jax
import jax.numpy as jnp
from jax import lax
from jax.experimental import pallas as pl
from jax.experimental.pallas import tpu as pltpu

LANE = 128                            # f32: 128 lanes * 4 B = 512 B per row DMA
MAX_TILE = 512                        # max gathered rows per grid step
OUT_BLOCK_BYTES = 8 * 1024 * 1024     # per pipelined output block (x2 buffers)
ONE_HOT_BYTES = 4 * 1024 * 1024       # budget for the (tile, rows) one-hot
VMEM_TABLE_BYTES = 4 * 1024 * 1024    # fast-path threshold: padded table size
MAX_IDS_PER_CALL = 64 * 1024          # SMEM guard for scalar-prefetched ids
VMEM_LIMIT = 32 * 1024 * 1024         # scoped VMEM budget, safe on v5e/v6e/v7x


def _round_up(x: int, m: int) -> int:
    return (x + m - 1) // m * m


def _round_down(x: int, m: int) -> int:
    return max(m, (x // m) * m)


# --------------------------------------------------------------------------
# Kernels
# --------------------------------------------------------------------------
def _gather_onehot_kernel(idx_ref, table_ref, out_ref):
    """VMEM fast path: gather rows with a one-hot matmul on the MXU.

    idx_ref   : VMEM int32[(tile, 1)]        per-tile (already offset) row ids
    table_ref : VMEM f32[(rows_pad, d_pad)]  full table, resident across grid
    out_ref   : VMEM f32[(tile, d_pad)]      pipelined output block
    """
    rows = table_ref.shape[0]
    ids = idx_ref[...]                                          # (tile, 1)
    cols = lax.broadcasted_iota(jnp.int32, (ids.shape[0], rows), 1)
    one_hot = (cols == ids).astype(table_ref.dtype)             # (tile, rows)
    out_ref[...] = jnp.dot(
        one_hot, table_ref[...], preferred_element_type=jnp.float32
    ).astype(out_ref.dtype)


def _gather_hbm_kernel(idx_ref, table_hbm, out_ref, sem):
    """HBM path: per-row DMAs straight into the pipelined output block.

    idx_ref   : SMEM int32[(b_pad,)]         scalar-prefetched row ids
    table_hbm : HBM  f32[(rows_pad, d_pad)]  full table, never copied wholesale
    out_ref   : VMEM f32[(tile, d_pad)]      pipelined output block (DMA target)
    sem       : DMA semaphore shared by every row copy of this step
    """
    tile = out_ref.shape[0]
    base = pl.multiple_of(pl.program_id(0) * tile, tile)

    def issue(r, carry):
        row = idx_ref[base + r]
        pltpu.make_async_copy(
            table_hbm.at[pl.ds(row, 1), :],
            out_ref.at[pl.ds(r, 1), :],
            sem,
        ).start()
        return carry

    # Issue all `tile` row DMAs up front (unrolled so descriptor issue is not
    # serialized on the scalar ALUs) and keep them in flight concurrently.
    lax.fori_loop(0, tile, issue, 0, unroll=8)

    # ONE wait retires every row copy of this step: the DMA semaphore counts
    # bytes and all row copies are exactly d_pad * itemsize bytes, so a
    # descriptor shaped like the whole output block waits for the total
    # tile * d_pad * itemsize bytes at once (src ref is shape-only here).
    pltpu.make_async_copy(out_ref, out_ref, sem).wait()


# --------------------------------------------------------------------------
# Wrapper
# --------------------------------------------------------------------------
def _pick_tile(batch: int, d_pad: int, itemsize: int, rows_pad: int,
               use_vmem_table: bool) -> int:
    # VMEM cap: each pipelined out block <= OUT_BLOCK_BYTES (x2 buffers).
    tile = min(MAX_TILE, _round_down(OUT_BLOCK_BYTES // (d_pad * itemsize), 8))
    if use_vmem_table:
        # Keep the (tile, rows_pad) one-hot matrix inside its budget too.
        tile = min(tile, _round_down(ONE_HOT_BYTES // (rows_pad * 4), 8))
    # Keep >= 2 grid steps when the batch allows it so both of v7x's
    # TensorCores get work (harmless on single-core v5e/v6e).
    half = _round_up(max((batch + 1) // 2, 1), 8)
    return max(8, min(tile, half))


def embedding_gather(table: jax.Array, idx: jax.Array, *,
                     num_valid_rows: int | None = None,
                     out_dim: int | None = None,
                     force_hbm: bool = False) -> jax.Array:
    """Pallas row gather: returns table[idx, :out_dim].

    `table` should already be padded (rows -> multiple of 8, cols -> lane
    multiple); the fallback pad below keeps direct calls correct anyway.
    """
    idx = idx.reshape(-1)
    n_rows, dim = table.shape
    itemsize = jnp.dtype(table.dtype).itemsize
    if num_valid_rows is None:
        num_valid_rows = n_rows
    if out_dim is None:
        out_dim = dim

    lane = max(LANE, -(-512 // itemsize))        # every row DMA >= 512 B
    d_pad = _round_up(dim, lane)
    rows_pad = _round_up(n_rows, 8)
    if d_pad != dim or rows_pad != n_rows:
        table = jnp.pad(table, ((0, rows_pad - n_rows), (0, d_pad - dim)))

    b = int(idx.shape[0])
    if b == 0:
        return jnp.zeros((0, out_dim), table.dtype)

    # Chunk huge batches so scalar-prefetched ids never overflow SMEM.
    if b > MAX_IDS_PER_CALL:
        parts = [
            embedding_gather(table, idx[i:i + MAX_IDS_PER_CALL],
                             num_valid_rows=num_valid_rows, out_dim=out_dim,
                             force_hbm=force_hbm)
            for i in range(0, b, MAX_IDS_PER_CALL)
        ]
        return jnp.concatenate(parts, axis=0)

    table_bytes = rows_pad * d_pad * itemsize
    use_vmem_table = (table_bytes <= VMEM_TABLE_BYTES) and not force_hbm

    tile = _pick_tile(b, d_pad, itemsize, rows_pad, use_vmem_table)
    b_pad = _round_up(b, tile)

    # Safety clamp: dynamic HBM DMAs have no useful OOB behavior for bad ids.
    # TODO(synk): PyTorch index_select raises on out-of-range ids; add a
    # debug-mode assert instead of silently clamping.
    idx = jnp.clip(idx.astype(jnp.int32), 0, num_valid_rows - 1)
    idx = jnp.pad(idx, (0, b_pad - b))           # padded tail gathers row 0

    params = pltpu.CompilerParams(dimension_semantics=("parallel",),
                                  vmem_limit_bytes=VMEM_LIMIT)
    grid = (b_pad // tile,)

    if use_vmem_table:
        out = pl.pallas_call(
            _gather_onehot_kernel,
            out_shape=jax.ShapeDtypeStruct((b_pad, d_pad), table.dtype),
            grid_spec=pltpu.PrefetchScalarGridSpec(
                num_scalar_prefetch=0,
                grid=grid,
                in_specs=[
                    pl.BlockSpec((tile, 1), lambda t: (t, 0)),
                    # Constant index_map -> table fetched once, stays resident.
                    pl.BlockSpec((rows_pad, d_pad), lambda t: (0, 0)),
                ],
                out_specs=pl.BlockSpec((tile, d_pad), lambda t: (t, 0)),
            ),
            compiler_params=params,
        )(idx.reshape(b_pad, 1), table)
    else:
        out = pl.pallas_call(
            _gather_hbm_kernel,
            out_shape=jax.ShapeDtypeStruct((b_pad, d_pad), table.dtype),
            grid_spec=pltpu.PrefetchScalarGridSpec(
                num_scalar_prefetch=1,
                grid=grid,
                in_specs=[pl.BlockSpec(memory_space=pl.ANY)],
                out_specs=pl.BlockSpec((tile, d_pad),
                                       lambda t, idx_ref: (t, 0)),
                scratch_shapes=[pltpu.SemaphoreType.DMA(())],
            ),
            compiler_params=params,
        )(idx, table)

    # Single post-kernel slice (batch rows and real embedding dim at once).
    return out[:b, :out_dim]


# --------------------------------------------------------------------------
# Model
# --------------------------------------------------------------------------
class MetaPath2VecJAX:
    """Minimal JAX port of MetaPath2Vec holding the embedding table and the
    per-node-type [start, end) offsets; forward() matches PyTorch semantics.
    """

    def __init__(self, embedding_dim, metapath, num_nodes_dict, key):
        types = sorted({x[0] for x in metapath} | {x[-1] for x in metapath})
        count = 0
        self.start, self.end = {}, {}
        for k in types:
            self.start[k] = count
            count += num_nodes_dict[k]
            self.end[k] = count
        self.dummy_idx = count
        self.embedding_dim = embedding_dim
        self.num_rows = count + 1
        # torch.nn.Embedding.reset_parameters() draws from N(0, 1).
        self.embedding_weight = jax.random.normal(
            key, (self.num_rows, embedding_dim), dtype=jnp.float32)
        # Pad once at init (never per call): rows -> multiple of 8,
        # cols -> multiple of 128 lanes (>= 512 B per f32 row DMA).
        d_pad = _round_up(embedding_dim, LANE)
        rows_pad = _round_up(self.num_rows, 8)
        self._table_padded = jnp.pad(
            self.embedding_weight,
            ((0, rows_pad - self.num_rows), (0, d_pad - embedding_dim)))
        # TODO(synk): random-walk sampling (_pos_sample/_neg_sample), loader(),
        # the negative-sampling loss() and the sklearn-based test() are
        # training / evaluation utilities outside forward(); not ported.

    def forward(self, node_type, batch=None, *, force_hbm=False):
        s, e = self.start[node_type], self.end[node_type]
        if batch is None:
            # Contiguous slice: a plain XLA slice is already a full-bandwidth
            # copy; routing it through a gather kernel would only add overhead.
            return self.embedding_weight[s:e]
        idx = batch.astype(jnp.int32) + s
        return embedding_gather(self._table_padded, idx,
                                num_valid_rows=self.num_rows,
                                out_dim=self.embedding_dim,
                                force_hbm=force_hbm)


# --------------------------------------------------------------------------
# Demo / correctness check
# --------------------------------------------------------------------------
if __name__ == "__main__":
    key = jax.random.PRNGKey(0)
    k_emb, k_b1, k_b2 = jax.random.split(key, 3)

    # Small heterogeneous graph: authors write papers, papers written_by authors.
    metapath = [("author", "writes", "paper"),
                ("paper", "written_by", "author")]
    num_nodes_dict = {"author": 8, "paper": 12}
    embedding_dim = 32

    model = MetaPath2VecJAX(embedding_dim, metapath, num_nodes_dict, k_emb)

    batch_a = jax.random.randint(k_b1, (6,), 0, num_nodes_dict["author"],
                                 dtype=jnp.int32)
    batch_p = jax.random.randint(k_b2, (5,), 0, num_nodes_dict["paper"],
                                 dtype=jnp.int32)

    # VMEM fast path (table resident, one-hot MXU gather).
    out_a = jax.block_until_ready(model.forward("author", batch_a))
    out_p = jax.block_until_ready(model.forward("paper", batch_p))
    # HBM path (per-row DMA straight into the pipelined output block).
    out_a_hbm = jax.block_until_ready(
        model.forward("author", batch_a, force_hbm=True))
    # batch=None (full contiguous slice; kernel bypass).
    out_all = jax.block_until_ready(model.forward("paper"))

    # Reference check against plain-JAX semantics.
    w = model.embedding_weight
    ref_a = w[model.start["author"]:model.end["author"]][batch_a]
    ref_p = w[model.start["paper"]:model.end["paper"]][batch_p]
    ref_all = w[model.start["paper"]:model.end["paper"]]

    assert out_a.shape == (6, embedding_dim)
    assert out_p.shape == (5, embedding_dim)
    assert out_a_hbm.shape == (6, embedding_dim)
    assert out_all.shape == (num_nodes_dict["paper"], embedding_dim)
    assert jnp.allclose(out_a, ref_a)
    assert jnp.allclose(out_p, ref_p)
    assert jnp.allclose(out_a_hbm, ref_a)
    assert jnp.allclose(out_all, ref_all)

    print("KERNEL_OK")
</pallas_src>

<mosaic_0001>
module attributes {stable_mosaic.version = 11 : i64} {
  func.func @_gather_onehot_kernel(%arg0: i32, %arg1: memref<8x1xi32, #tpu.memory_space<vmem>>, %arg2: memref<24x128xf32, #tpu.memory_space<vmem>>, %arg3: memref<8x128xf32, #tpu.memory_space<vmem>>) attributes {dimension_semantics = [#tpu.dimension_semantics<parallel>], iteration_bounds = array<i64: 1>, scalar_prefetch = 0 : i64, scratch_operands = 0 : i64, tpu.core_type = #tpu.core_type<tc>, window_params = [{transform_indices = @transform_0, window_bounds = array<i64: 8, 1>}, {pipeline_mode = #tpu.pipeline_mode<synchronous>, transform_indices = @transform_1, window_bounds = array<i64: 24, 128>}, {transform_indices = @transform_2, window_bounds = array<i64: 8, 128>}]} {
    %c0 = arith.constant 0 : index
    %c0_0 = arith.constant 0 : index
    %0 = vector.load %arg1[%c0, %c0_0] : memref<8x1xi32, #tpu.memory_space<vmem>>, vector<8x1xi32>
    %1 = tpu.iota {dimensions = array<i32: 1>} : vector<8x24xi32>
    %2 = vector.broadcast %0 : vector<8x1xi32> to vector<8x24xi32>
    %3 = arith.cmpi eq, %1, %2 : vector<8x24xi32>
    %4 = arith.extui %3 : vector<8x24xi1> to vector<8x24xi32>
    %5 = arith.sitofp %4 : vector<8x24xi32> to vector<8x24xf32>
    %c0_1 = arith.constant 0 : index
    %c0_2 = arith.constant 0 : index
    %6 = vector.load %arg2[%c0_1, %c0_2] : memref<24x128xf32, #tpu.memory_space<vmem>>, vector<24x128xf32>
    %cst = arith.constant dense<0.000000e+00> : vector<8x128xf32>
    %7 = tpu.matmul %5, %6, %cst {dimension_numbers = #tpu.dot_dimension_numbers<[1], [0], [0], [1], [0, 0, 1, 1], [], []>} : vector<8x24xf32>, vector<24x128xf32>, vector<8x128xf32> -> vector<8x128xf32>
    %c0_3 = arith.constant 0 : index
    %c0_4 = arith.constant 0 : index
    %8 = vector.load %arg3[%c0_3, %c0_4] : memref<8x128xf32, #tpu.memory_space<vmem>>, vector<8x128xf32>
    tpu.vector_store %arg3[%c0_3, %c0_4], %7 {strides = array<i32>} : memref<8x128xf32, #tpu.memory_space<vmem>>, vector<8x128xf32>,
    return
  }
  func.func @transform_0(%arg0: i32) -> (i32, i32) {
    %c0_i32 = arith.constant 0 : i32
    %c0_i32_0 = arith.constant 0 : i32
    return %arg0, %c0_i32 : i32, i32
  }
  func.func @transform_1(%arg0: i32) -> (i32, i32) {
    %c0_i32 = arith.constant 0 : i32
    %c0_i32_0 = arith.constant 0 : i32
    %c0_i32_1 = arith.constant 0 : i32
    return %c0_i32, %c0_i32_0 : i32, i32
  }
  func.func @transform_2(%arg0: i32) -> (i32, i32) {
    %c0_i32 = arith.constant 0 : i32
    %c0_i32_0 = arith.constant 0 : i32
    return %arg0, %c0_i32 : i32, i32
  }
}

</mosaic_0001>

<bundles_post_ra>
// kernel: tpu_custom_call.1
= control target key start
LH: loop header
LB: loop body
LE: loop exit
PB: predicated region body
PF: predicated region fallthrough
CT: control target
= control target key end

     0   :  { %7 = vsyncpa [#allocation3], 0  ;;  %s253_s0 = inlined_call_operand.vmem [shape: s32[8,1], index: 0, kind: input, shape index: {}]   ;;  %s254_s1 = inlined_call_operand.hbm [shape: f32[24,128], index: 1, kind: input, shape index: {}]   ;;  %s255_s2 = inlined_call_operand.hbm [shape: f32[8,128], index: 2, kind: output, shape index: {}]  }
   0x1   :  { %8 = vsyncpa [#allocation4], 0  ;;  %s203_s9 = smov [#allocation2]   ;;  %s155_s13 = scalar_lea.hbm %s254_s1, 384 }
   0x2   :  { %s16_s10 = sshll.u32 %s203_s9, 4  ;;  %p156_p0 = scmp.ne.s32.totalorder %s254_s1, %s155_s13  ;;  %s17_s10 = int_to_ptr.vmem [resolvable:$true] %s16_s10 }
   0x3   :  { %p159_p1 = scmp.lt.u32.totalorder %s155_s13, %s254_s1 }
   0x5   :  { %p161_p2 = pnand %p159_p1, %p156_p0 }
   0x7   :  { %164 = shalt.err (!%p161_p2)
}
   0x8   :  { %s165_s18 = scalar_lea.vmem %s17_s10, 384  ;;  %p170_p4 = scmp.lt.s32.totalorder %s17_s10, %s17_s10 }
   0x9   :  { %p166_p3 = scmp.ne.s32.totalorder %s17_s10, %s165_s18  ;;  %p171_p5 = scmp.lt.s32.totalorder %s165_s18, %s165_s18 }
   0xb   :  { %p172_p6 = por %p171_p5, %p170_p4 }
   0xd   :  { %p173_p7 = pnand %p172_p6, %p166_p3 }
   0xf   :  { %176 = shalt.err (!%p173_p7)
}
  0x10   :  { %s204_s19 = smov 128   ;;  %s205_s20 = smov 8  }
  0x11   :  { %22 = dma.hbm_to_vmem [thread:$0]  %s254_s1, 384, %s17_s10, [#allocation3], %s204_s19, %s204_s19, %s205_s20  }
  0x12   :  { %199 = dma.done.wait [#allocation3], 384  }
  0x13   :  { %200 = vsyncadd [#allocation3], 4294966912  ;;  %v206_v0 = vmov 0   ;;  %v207_v1 = vmov 0.0|0.0   ;;  %v26_v2 = vld [vmem:[%s253_s0] sm:$0xff]  ;;  %v36_v4 = vld [vmem:[#allocation2 + $0x8] sm:$0xff]  ;;  %v27_v8 = vlaneseq }
  0x14   :  { %154 = vset.pattern.permute.xlu0 %v206_v0  ;;  %143 = vmatprep.subr.bf16.mxu0 %v207_v1  ;;  %v35_v3 = vld [vmem:[#allocation2] sm:$0xff]  ;;  %vm208_vm0 = vmmov 0   ;;  %v209_v6 = vmov 0.0   ;;  %v37_v7 = vld [vmem:[#allocation2 + $0x10] sm:$0xff]  ;;  %vm38_vm1 = vcmask 195584   ;;  %s210_s1 = smov [#allocation5]  }
  0x15   :  { %30 = vperm.xlu0 %154, %v26_v2   ;;  %v144_v5 = vpack.c.bf16 %v36_v4, %v35_v3  ;;  %140 = vmatprep.mubr.msk.f32.mxu0 %vm208_vm0, %v209_v6  ;;  %v28_v9 = vand.u32 127, %v27_v8  ;;  %s119_s0 = sshll.u32 %s210_s1, 4  ;;  %s120_s0 = int_to_ptr.vmem [resolvable:$true] %s119_s0 }
  0x16   :  { %s177_s25 = scalar_lea.vmem %s120_s0, 128  ;;  %p182_p9 = scmp.lt.s32.totalorder %s120_s0, %s120_s0 }
  0x17   :  { %145 = vmatpush3.bf16.msra.mxu0 %v144_v5  ;;  %p178_p8 = scmp.ne.s32.totalorder %s120_s0, %s177_s25  ;;  %p183_p10 = scmp.lt.s32.totalorder %s177_s25, %s177_s25 }
  0x18   :  { %138 = vmatprep.subr.mxu0 %v209_v6 }
  0x19   :  { %p184_p11 = por %p183_p10, %p182_p9 }
  0x1b   :  { %139 = vmatpush3.msra.mxu0 %v37_v7  ;;  %p185_p12 = pnand %p184_p11, %p178_p8 }
  0x94   :  { %v31_v10 = vpop.permute.xlu0 %30 }
  0x95   :  { %vm32_vm2 = vcmp.eq.s32.totalorder %v28_v9, %v31_v10 }
  0x96   :  { %v128_v11 = vsel %vm32_vm2, 1.0, %v209_v6 }
  0x97   :  { %141 = vmatmul.mubr.msk.f32.vlgmr.msra.gmra.mrb[0].mxu0 %vm38_vm1, %v128_v11 }
 0x16a   :  { %v108_v12 = vpop.f32.mrb[0].mxu0 }
 0x16b   :  { %112 = vst [vmem:[#allocation5] sm:$0xff] %v108_v12  ;;  %v142_v13 = vpop.f32.mrb[1].mxu0 }
 0x16c   :  { %188 = shalt.err (!%p185_p12)
}
 0x16d   :  { %s189_s28 = scalar_lea.hbm %s255_s2, 128 }
 0x16e   :  { %p190_p13 = scmp.ne.s32.totalorder %s255_s2, %s189_s28  ;;  %p193_p0 = scmp.lt.u32.totalorder %s189_s28, %s255_s2 }
 0x170   :  { %p195_p1 = pnand %p193_p0, %p190_p13 }
 0x172   :  { %198 = shalt.err (!%p195_p1)
}
 0x173   :  { %122 = dma.vmem_to_hbm [thread:$0]  %s120_s0, 128, %s255_s2, [#allocation4]  }
 0x174   :  { %201 = dma.done.wait [#allocation4], 128  }
 0x175   :  { %202 = vsyncadd [#allocation4], 4294967168 }
 0x176   :  { %126 = vsyncpa [#allocation3], 1 }
 0x177   :  { %127 = vsyncpa [#allocation4], 1 }

</bundles_post_ra>
